<compile_context>
chip_gen: v7x
topology: tpu7x:2x2x1
jax: 0.10.0
libtpu: 0.0.40
codegen_flags: <defaults>
</compile_context>

<pallas_src>
import math

import jax
import jax.numpy as jnp
from jax.experimental import pallas as pl
from jax.experimental.pallas import tpu as pltpu


def _round_up(x: int, m: int) -> int:
    return ((x + m - 1) // m) * m


def _make_gather_kernel(scale: float, tm: int, nbuf: int):
    def kernel(ids_ref, emb_hbm, out_ref, row_buf, sem):
        # ids_ref: (n_pad,) int32 token ids in SMEM (scalar-prefetched).
        # emb_hbm: (vocab, E) embedding table left in HBM (pl.ANY).
        # out_ref: (tm, E)   output block in VMEM.
        # row_buf: (nbuf, 1, E) VMEM ring of row landing buffers.
        # sem:     (nbuf,)   DMA completion semaphores.
        base = pl.program_id(0) * tm

        def issue(t):
            slot = t % nbuf
            tok = ids_ref[base + t]
            pltpu.make_async_copy(
                emb_hbm.at[pl.ds(tok, 1), :], row_buf.at[slot], sem.at[slot]
            ).start()

        # Prime the ring: up to `nbuf` outstanding row fetches.
        for t in range(nbuf):
            issue(t)

        @pl.loop(0, tm)
        def _(t):
            slot = t % nbuf
            pltpu.make_async_copy(
                emb_hbm.at[pl.ds(0, 1), :], row_buf.at[slot], sem.at[slot]
            ).wait()
            # Consume (scale + store) BEFORE re-issuing into the same slot,
            # so there is no WAR hazard on the landing buffer.
            out_ref[pl.ds(t, 1), :] = (row_buf[slot] * scale).astype(out_ref.dtype)

            @pl.when(t + nbuf < tm)
            def _():
                issue(t + nbuf)

    return kernel


def token_embedding(tokens: jax.Array, emb_table: jax.Array,
                    *, tm_max: int = 256, nbuf_max: int = 8) -> jax.Array:
    """Pallas TPU implementation of TokenEmbedding.forward.

    tokens: integer array, any shape. emb_table: (vocab_size, emb_size).
    Returns tokens.shape + (emb_size,) = emb_table[tokens] * sqrt(emb_size).
    Token ids must lie in [0, vocab_size), same as nn.Embedding.
    """
    vocab_size, emb_size = emb_table.shape
    scale = math.sqrt(emb_size)
    itemsize = emb_table.dtype.itemsize

    tok_flat = tokens.reshape(-1).astype(jnp.int32)   # .long() equivalent
    n_tok = tok_flat.shape[0]

    # Token-block size: multiple of 8 (sublane), capped so the double-buffered
    # (TM, E) output block stays around <= 8 MiB (safe on v5e/v6e/v7x defaults).
    vmem_out_budget = 8 * 1024 * 1024
    tm_cap = max(8, (vmem_out_budget // (2 * emb_size * itemsize)) // 8 * 8)
    tm = min(tm_max, tm_cap, _round_up(max(n_tok, 1), 8))
    n_pad = _round_up(n_tok, tm)
    n_blocks = n_pad // tm
    nbuf = min(nbuf_max, tm)

    # Pad tokens with id 0 (always in range); pad rows are sliced off below.
    tok_p = jnp.pad(tok_flat, (0, n_pad - n_tok))

    # Generation-aware VMEM limit derived from the actual tiles (v7x has only
    # 64 MiB physical; our tiles are far smaller, so just leave headroom).
    out_bytes = 2 * tm * emb_size * itemsize
    buf_bytes = 2 * nbuf * emb_size * itemsize
    vmem_limit = int(min(64 * 1024 * 1024,
                         max(16 * 1024 * 1024, 2 * (out_bytes + buf_bytes))))

    kernel = _make_gather_kernel(scale, tm, nbuf)

    out = pl.pallas_call(
        kernel,
        out_shape=jax.ShapeDtypeStruct((n_pad, emb_size), emb_table.dtype),
        grid_spec=pltpu.PrefetchScalarGridSpec(
            num_scalar_prefetch=1,               # token ids -> SMEM
            grid=(n_blocks,),
            in_specs=[
                # Embedding table stays in HBM; rows are DMA-gathered manually.
                pl.BlockSpec(memory_space=pl.ANY),
            ],
            out_specs=pl.BlockSpec((tm, emb_size), lambda i, ids: (i, 0)),
            scratch_shapes=[
                pltpu.VMEM((nbuf, 1, emb_size), emb_table.dtype),
                pltpu.SemaphoreType.DMA((nbuf,)),
            ],
        ),
        compiler_params=pltpu.CompilerParams(
            dimension_semantics=("parallel",),
            vmem_limit_bytes=vmem_limit,
        ),
    )(tok_p, emb_table)

    return out[:n_tok].reshape(tokens.shape + (emb_size,))


if __name__ == "__main__":
    key = jax.random.PRNGKey(0)

    # --- Test 1: shapes consistent with the module (single token block). ---
    vocab_size, emb_size = 64, 128
    seq_len, batch = 8, 2

    k_emb, k_tok, k_emb2, k_tok2 = jax.random.split(key, 4)
    emb_table = jax.random.normal(k_emb, (vocab_size, emb_size), dtype=jnp.float32)
    tokens = jax.random.randint(k_tok, (seq_len, batch), 0, vocab_size, dtype=jnp.int32)

    out = token_embedding(tokens, emb_table)
    out = jax.block_until_ready(out)

    ref = emb_table[tokens] * math.sqrt(emb_size)
    assert out.shape == (seq_len, batch, emb_size)
    assert jnp.allclose(out, ref, atol=1e-6, rtol=1e-6)

    # --- Test 2: odd vocab, more tokens, forced multi-block grid + padding. ---
    vocab2, emb2 = 1030, 256
    emb_table2 = jax.random.normal(k_emb2, (vocab2, emb2), dtype=jnp.float32)
    tokens2 = jax.random.randint(k_tok2, (37, 3), 0, vocab2, dtype=jnp.int32)

    out2 = token_embedding(tokens2, emb_table2, tm_max=32)  # 4 blocks, ragged tail
    out2 = jax.block_until_ready(out2)

    ref2 = emb_table2[tokens2] * math.sqrt(emb2)
    assert out2.shape == (37, 3, emb2)
    assert jnp.allclose(out2, ref2, atol=1e-6, rtol=1e-6)

    print("KERNEL_OK")
</pallas_src>

<mosaic_0001>
module attributes {stable_mosaic.version = 11 : i64} {
  func.func @kernel(%arg0: i32, %arg1: memref<16xi32, #tpu.memory_space<smem>>, %arg2: memref<64x128xf32, #tpu.memory_space<any>>, %arg3: memref<16x128xf32, #tpu.memory_space<vmem>>, %arg4: memref<8x1x128xf32, #tpu.memory_space<vmem>>, %arg5: memref<8x!tpu.dma_semaphore, #tpu.memory_space<semaphore_mem>>) attributes {dimension_semantics = [#tpu.dimension_semantics<parallel>], iteration_bounds = array<i64: 1>, scalar_prefetch = 1 : i64, scratch_operands = 2 : i64, tpu.core_type = #tpu.core_type<tc>, window_params = [{}, {transform_indices = @transform_1, window_bounds = array<i64: 16, 128>}]} {
    %c16_i32 = arith.constant 16 : i32
    %0 = arith.muli %arg0, %c16_i32 : i32
    %c0_i32 = arith.constant 0 : i32
    %1 = arith.addi %0, %c0_i32 : i32
    %2 = arith.index_cast %1 : i32 to index
    %3 = memref.load %arg1[%2] : memref<16xi32, #tpu.memory_space<smem>>
    %c0_i32_0 = arith.constant 0 : i32
    %c0_i32_1 = arith.constant 0 : i32
    %c0_i32_2 = arith.constant 0 : i32
    %4 = tpu.memref_slice %arg2[%3, %c0_i32_2] : memref<64x128xf32, #tpu.memory_space<any>> -> memref<1x128xf32, #tpu.memory_space<any>>
    %c0_i32_3 = arith.constant 0 : i32
    %c0_i32_4 = arith.constant 0 : i32
    %5 = tpu.memref_slice %arg4[%c0_i32_0, %c0_i32_3, %c0_i32_4] : memref<8x1x128xf32, #tpu.memory_space<vmem>> -> memref<1x1x128xf32, #tpu.memory_space<vmem>>
    %6 = tpu.memref_squeeze %5 : memref<1x1x128xf32, #tpu.memory_space<vmem>> -> memref<1x128xf32, #tpu.memory_space<vmem>>
    %7 = tpu.memref_slice %arg5[%c0_i32_1] : memref<8x!tpu.dma_semaphore, #tpu.memory_space<semaphore_mem>> -> memref<1x!tpu.dma_semaphore, #tpu.memory_space<semaphore_mem>>
    %8 = tpu.memref_squeeze %7 : memref<1x!tpu.dma_semaphore, #tpu.memory_space<semaphore_mem>> -> memref<!tpu.dma_semaphore, #tpu.memory_space<semaphore_mem>>
    tpu.enqueue_dma source(%4 : memref<1x128xf32, #tpu.memory_space<any>>) target(%6 : memref<1x128xf32, #tpu.memory_space<vmem>>) target_semaphore(%8 : memref<!tpu.dma_semaphore, #tpu.memory_space<semaphore_mem>>)
    %c1_i32 = arith.constant 1 : i32
    %9 = arith.addi %0, %c1_i32 : i32
    %10 = arith.index_cast %9 : i32 to index
    %11 = memref.load %arg1[%10] : memref<16xi32, #tpu.memory_space<smem>>
    %c1_i32_5 = arith.constant 1 : i32
    %c1_i32_6 = arith.constant 1 : i32
    %c0_i32_7 = arith.constant 0 : i32
    %12 = tpu.memref_slice %arg2[%11, %c0_i32_7] : memref<64x128xf32, #tpu.memory_space<any>> -> memref<1x128xf32, #tpu.memory_space<any>>
    %c0_i32_8 = arith.constant 0 : i32
    %c0_i32_9 = arith.constant 0 : i32
    %13 = tpu.memref_slice %arg4[%c1_i32_5, %c0_i32_8, %c0_i32_9] : memref<8x1x128xf32, #tpu.memory_space<vmem>> -> memref<1x1x128xf32, #tpu.memory_space<vmem>>
    %14 = tpu.memref_squeeze %13 : memref<1x1x128xf32, #tpu.memory_space<vmem>> -> memref<1x128xf32, #tpu.memory_space<vmem>>
    %15 = tpu.memref_slice %arg5[%c1_i32_6] : memref<8x!tpu.dma_semaphore, #tpu.memory_space<semaphore_mem>> -> memref<1x!tpu.dma_semaphore, #tpu.memory_space<semaphore_mem>>
    %16 = tpu.memref_squeeze %15 : memref<1x!tpu.dma_semaphore, #tpu.memory_space<semaphore_mem>> -> memref<!tpu.dma_semaphore, #tpu.memory_space<semaphore_mem>>
    tpu.enqueue_dma source(%12 : memref<1x128xf32, #tpu.memory_space<any>>) target(%14 : memref<1x128xf32, #tpu.memory_space<vmem>>) target_semaphore(%16 : memref<!tpu.dma_semaphore, #tpu.memory_space<semaphore_mem>>)
    %c2_i32 = arith.constant 2 : i32
    %17 = arith.addi %0, %c2_i32 : i32
    %18 = arith.index_cast %17 : i32 to index
    %19 = memref.load %arg1[%18] : memref<16xi32, #tpu.memory_space<smem>>
    %c2_i32_10 = arith.constant 2 : i32
    %c2_i32_11 = arith.constant 2 : i32
    %c0_i32_12 = arith.constant 0 : i32
    %20 = tpu.memref_slice %arg2[%19, %c0_i32_12] : memref<64x128xf32, #tpu.memory_space<any>> -> memref<1x128xf32, #tpu.memory_space<any>>
    %c0_i32_13 = arith.constant 0 : i32
    %c0_i32_14 = arith.constant 0 : i32
    %21 = tpu.memref_slice %arg4[%c2_i32_10, %c0_i32_13, %c0_i32_14] : memref<8x1x128xf32, #tpu.memory_space<vmem>> -> memref<1x1x128xf32, #tpu.memory_space<vmem>>
    %22 = tpu.memref_squeeze %21 : memref<1x1x128xf32, #tpu.memory_space<vmem>> -> memref<1x128xf32, #tpu.memory_space<vmem>>
    %23 = tpu.memref_slice %arg5[%c2_i32_11] : memref<8x!tpu.dma_semaphore, #tpu.memory_space<semaphore_mem>> -> memref<1x!tpu.dma_semaphore, #tpu.memory_space<semaphore_mem>>
    %24 = tpu.memref_squeeze %23 : memref<1x!tpu.dma_semaphore, #tpu.memory_space<semaphore_mem>> -> memref<!tpu.dma_semaphore, #tpu.memory_space<semaphore_mem>>
    tpu.enqueue_dma source(%20 : memref<1x128xf32, #tpu.memory_space<any>>) target(%22 : memref<1x128xf32, #tpu.memory_space<vmem>>) target_semaphore(%24 : memref<!tpu.dma_semaphore, #tpu.memory_space<semaphore_mem>>)
    %c3_i32 = arith.constant 3 : i32
    %25 = arith.addi %0, %c3_i32 : i32
    %26 = arith.index_cast %25 : i32 to index
    %27 = memref.load %arg1[%26] : memref<16xi32, #tpu.memory_space<smem>>
    %c3_i32_15 = arith.constant 3 : i32
    %c3_i32_16 = arith.constant 3 : i32
    %c0_i32_17 = arith.constant 0 : i32
    %28 = tpu.memref_slice %arg2[%27, %c0_i32_17] : memref<64x128xf32, #tpu.memory_space<any>> -> memref<1x128xf32, #tpu.memory_space<any>>
    %c0_i32_18 = arith.constant 0 : i32
    %c0_i32_19 = arith.constant 0 : i32
    %29 = tpu.memref_slice %arg4[%c3_i32_15, %c0_i32_18, %c0_i32_19] : memref<8x1x128xf32, #tpu.memory_space<vmem>> -> memref<1x1x128xf32, #tpu.memory_space<vmem>>
    %30 = tpu.memref_squeeze %29 : memref<1x1x128xf32, #tpu.memory_space<vmem>> -> memref<1x128xf32, #tpu.memory_space<vmem>>
    %31 = tpu.memref_slice %arg5[%c3_i32_16] : memref<8x!tpu.dma_semaphore, #tpu.memory_space<semaphore_mem>> -> memref<1x!tpu.dma_semaphore, #tpu.memory_space<semaphore_mem>>
    %32 = tpu.memref_squeeze %31 : memref<1x!tpu.dma_semaphore, #tpu.memory_space<semaphore_mem>> -> memref<!tpu.dma_semaphore, #tpu.memory_space<semaphore_mem>>
    tpu.enqueue_dma source(%28 : memref<1x128xf32, #tpu.memory_space<any>>) target(%30 : memref<1x128xf32, #tpu.memory_space<vmem>>) target_semaphore(%32 : memref<!tpu.dma_semaphore, #tpu.memory_space<semaphore_mem>>)
    %c4_i32 = arith.constant 4 : i32
    %33 = arith.addi %0, %c4_i32 : i32
    %34 = arith.index_cast %33 : i32 to index
    %35 = memref.load %arg1[%34] : memref<16xi32, #tpu.memory_space<smem>>
    %c4_i32_20 = arith.constant 4 : i32
    %c4_i32_21 = arith.constant 4 : i32
    %c0_i32_22 = arith.constant 0 : i32
    %36 = tpu.memref_slice %arg2[%35, %c0_i32_22] : memref<64x128xf32, #tpu.memory_space<any>> -> memref<1x128xf32, #tpu.memory_space<any>>
    %c0_i32_23 = arith.constant 0 : i32
    %c0_i32_24 = arith.constant 0 : i32
    %37 = tpu.memref_slice %arg4[%c4_i32_20, %c0_i32_23, %c0_i32_24] : memref<8x1x128xf32, #tpu.memory_space<vmem>> -> memref<1x1x128xf32, #tpu.memory_space<vmem>>
    %38 = tpu.memref_squeeze %37 : memref<1x1x128xf32, #tpu.memory_space<vmem>> -> memref<1x128xf32, #tpu.memory_space<vmem>>
    %39 = tpu.memref_slice %arg5[%c4_i32_21] : memref<8x!tpu.dma_semaphore, #tpu.memory_space<semaphore_mem>> -> memref<1x!tpu.dma_semaphore, #tpu.memory_space<semaphore_mem>>
    %40 = tpu.memref_squeeze %39 : memref<1x!tpu.dma_semaphore, #tpu.memory_space<semaphore_mem>> -> memref<!tpu.dma_semaphore, #tpu.memory_space<semaphore_mem>>
    tpu.enqueue_dma source(%36 : memref<1x128xf32, #tpu.memory_space<any>>) target(%38 : memref<1x128xf32, #tpu.memory_space<vmem>>) target_semaphore(%40 : memref<!tpu.dma_semaphore, #tpu.memory_space<semaphore_mem>>)
    %c5_i32 = arith.constant 5 : i32
    %41 = arith.addi %0, %c5_i32 : i32
    %42 = arith.index_cast %41 : i32 to index
    %43 = memref.load %arg1[%42] : memref<16xi32, #tpu.memory_space<smem>>
    %c5_i32_25 = arith.constant 5 : i32
    %c5_i32_26 = arith.constant 5 : i32
    %c0_i32_27 = arith.constant 0 : i32
    %44 = tpu.memref_slice %arg2[%43, %c0_i32_27] : memref<64x128xf32, #tpu.memory_space<any>> -> memref<1x128xf32, #tpu.memory_space<any>>
    %c0_i32_28 = arith.constant 0 : i32
    %c0_i32_29 = arith.constant 0 : i32
    %45 = tpu.memref_slice %arg4[%c5_i32_25, %c0_i32_28, %c0_i32_29] : memref<8x1x128xf32, #tpu.memory_space<vmem>> -> memref<1x1x128xf32, #tpu.memory_space<vmem>>
    %46 = tpu.memref_squeeze %45 : memref<1x1x128xf32, #tpu.memory_space<vmem>> -> memref<1x128xf32, #tpu.memory_space<vmem>>
    %47 = tpu.memref_slice %arg5[%c5_i32_26] : memref<8x!tpu.dma_semaphore, #tpu.memory_space<semaphore_mem>> -> memref<1x!tpu.dma_semaphore, #tpu.memory_space<semaphore_mem>>
    %48 = tpu.memref_squeeze %47 : memref<1x!tpu.dma_semaphore, #tpu.memory_space<semaphore_mem>> -> memref<!tpu.dma_semaphore, #tpu.memory_space<semaphore_mem>>
    tpu.enqueue_dma source(%44 : memref<1x128xf32, #tpu.memory_space<any>>) target(%46 : memref<1x128xf32, #tpu.memory_space<vmem>>) target_semaphore(%48 : memref<!tpu.dma_semaphore, #tpu.memory_space<semaphore_mem>>)
    %c6_i32 = arith.constant 6 : i32
    %49 = arith.addi %0, %c6_i32 : i32
    %50 = arith.index_cast %49 : i32 to index
    %51 = memref.load %arg1[%50] : memref<16xi32, #tpu.memory_space<smem>>
    %c6_i32_30 = arith.constant 6 : i32
    %c6_i32_31 = arith.constant 6 : i32
    %c0_i32_32 = arith.constant 0 : i32
    %52 = tpu.memref_slice %arg2[%51, %c0_i32_32] : memref<64x128xf32, #tpu.memory_space<any>> -> memref<1x128xf32, #tpu.memory_space<any>>
    %c0_i32_33 = arith.constant 0 : i32
    %c0_i32_34 = arith.constant 0 : i32
    %53 = tpu.memref_slice %arg4[%c6_i32_30, %c0_i32_33, %c0_i32_34] : memref<8x1x128xf32, #tpu.memory_space<vmem>> -> memref<1x1x128xf32, #tpu.memory_space<vmem>>
    %54 = tpu.memref_squeeze %53 : memref<1x1x128xf32, #tpu.memory_space<vmem>> -> memref<1x128xf32, #tpu.memory_space<vmem>>
    %55 = tpu.memref_slice %arg5[%c6_i32_31] : memref<8x!tpu.dma_semaphore, #tpu.memory_space<semaphore_mem>> -> memref<1x!tpu.dma_semaphore, #tpu.memory_space<semaphore_mem>>
    %56 = tpu.memref_squeeze %55 : memref<1x!tpu.dma_semaphore, #tpu.memory_space<semaphore_mem>> -> memref<!tpu.dma_semaphore, #tpu.memory_space<semaphore_mem>>
    tpu.enqueue_dma source(%52 : memref<1x128xf32, #tpu.memory_space<any>>) target(%54 : memref<1x128xf32, #tpu.memory_space<vmem>>) target_semaphore(%56 : memref<!tpu.dma_semaphore, #tpu.memory_space<semaphore_mem>>)
    %c7_i32 = arith.constant 7 : i32
    %57 = arith.addi %0, %c7_i32 : i32
    %58 = arith.index_cast %57 : i32 to index
    %59 = memref.load %arg1[%58] : memref<16xi32, #tpu.memory_space<smem>>
    %c7_i32_35 = arith.constant 7 : i32
    %c7_i32_36 = arith.constant 7 : i32
    %c0_i32_37 = arith.constant 0 : i32
    %60 = tpu.memref_slice %arg2[%59, %c0_i32_37] : memref<64x128xf32, #tpu.memory_space<any>> -> memref<1x128xf32, #tpu.memory_space<any>>
    %c0_i32_38 = arith.constant 0 : i32
    %c0_i32_39 = arith.constant 0 : i32
    %61 = tpu.memref_slice %arg4[%c7_i32_35, %c0_i32_38, %c0_i32_39] : memref<8x1x128xf32, #tpu.memory_space<vmem>> -> memref<1x1x128xf32, #tpu.memory_space<vmem>>
    %62 = tpu.memref_squeeze %61 : memref<1x1x128xf32, #tpu.memory_space<vmem>> -> memref<1x128xf32, #tpu.memory_space<vmem>>
    %63 = tpu.memref_slice %arg5[%c7_i32_36] : memref<8x!tpu.dma_semaphore, #tpu.memory_space<semaphore_mem>> -> memref<1x!tpu.dma_semaphore, #tpu.memory_space<semaphore_mem>>
    %64 = tpu.memref_squeeze %63 : memref<1x!tpu.dma_semaphore, #tpu.memory_space<semaphore_mem>> -> memref<!tpu.dma_semaphore, #tpu.memory_space<semaphore_mem>>
    tpu.enqueue_dma source(%60 : memref<1x128xf32, #tpu.memory_space<any>>) target(%62 : memref<1x128xf32, #tpu.memory_space<vmem>>) target_semaphore(%64 : memref<!tpu.dma_semaphore, #tpu.memory_space<semaphore_mem>>)
    %c0_i32_40 = arith.constant 0 : i32
    %c16_i32_41 = arith.constant 16 : i32
    %65 = arith.addi %c0_i32_40, %c16_i32_41 : i32
    %c1_i32_42 = arith.constant 1 : i32
    scf.for %arg6 = %c0_i32_40 to %65 step %c1_i32_42  : i32 {
      %c1_i32_44 = arith.constant 1 : i32
      %66 = arith.muli %arg6, %c1_i32_44 : i32
      %c0_i32_45 = arith.constant 0 : i32
      %67 = arith.addi %c0_i32_45, %66 : i32
      %c8_i32 = arith.constant 8 : i32
      %c0_i32_46 = arith.constant 0 : i32
      %68 = arith.cmpi eq, %c8_i32, %c0_i32_46 : i32
      %c1_i32_47 = arith.constant 1 : i32
      %69 = arith.select %68, %c1_i32_47, %c8_i32 : i32
      %70 = arith.remsi %67, %69 : i32
      %c0_i32_48 = arith.constant 0 : i32
      %71 = arith.cmpi ne, %70, %c0_i32_48 : i32
      %c0_i32_49 = arith.constant 0 : i32
      %72 = arith.cmpi slt, %70, %c0_i32_49 : i32
      %c0_i32_50 = arith.constant 0 : i32
      %73 = arith.cmpi slt, %69, %c0_i32_50 : i32
      %74 = arith.xori %72, %73 : i1
      %75 = arith.andi %74, %71 : i1
      %76 = arith.addi %70, %69 : i32
      %77 = arith.select %75, %76, %70 : i32
      %c0_i32_51 = arith.constant 0 : i32
      %c0_i32_52 = arith.constant 0 : i32
      %78 = tpu.memref_slice %arg2[%c0_i32_51, %c0_i32_52] : memref<64x128xf32, #tpu.memory_space<any>> -> memref<1x128xf32, #tpu.memory_space<any>>
      %c0_i32_53 = arith.constant 0 : i32
      %c0_i32_54 = arith.constant 0 : i32
      %79 = tpu.memref_slice %arg4[%77, %c0_i32_53, %c0_i32_54] : memref<8x1x128xf32, #tpu.memory_space<vmem>> -> memref<1x1x128xf32, #tpu.memory_space<vmem>>
      %80 = tpu.memref_squeeze %79 : memref<1x1x128xf32, #tpu.memory_space<vmem>> -> memref<1x128xf32, #tpu.memory_space<vmem>>
      %81 = tpu.memref_slice %arg5[%77] : memref<8x!tpu.dma_semaphore, #tpu.memory_space<semaphore_mem>> -> memref<1x!tpu.dma_semaphore, #tpu.memory_space<semaphore_mem>>
      %82 = tpu.memref_squeeze %81 : memref<1x!tpu.dma_semaphore, #tpu.memory_space<semaphore_mem>> -> memref<!tpu.dma_semaphore, #tpu.memory_space<semaphore_mem>>
      tpu.wait_dma2 semaphore(%82 : memref<!tpu.dma_semaphore, #tpu.memory_space<semaphore_mem>>) src(%78 : memref<1x128xf32, #tpu.memory_space<any>>) dst(%80 : memref<1x128xf32, #tpu.memory_space<vmem>>)
      %83 = arith.index_cast %77 : i32 to index
      %c0 = arith.constant 0 : index
      %c0_55 = arith.constant 0 : index
      %84 = vector.load %arg4[%83, %c0, %c0_55] : memref<8x1x128xf32, #tpu.memory_space<vmem>>, vector<1x1x128xf32>
      %85 = vector.shape_cast %84 : vector<1x1x128xf32> to vector<1x128xf32>
      %cst = arith.constant 11.3137083 : f32
      %86 = vector.broadcast %cst : f32 to vector<1x128xf32>
      %87 = arith.mulf %85, %86 : vector<1x128xf32>
      %88 = arith.index_cast %67 : i32 to index
      %c0_56 = arith.constant 0 : index
      %89 = vector.load %arg3[%88, %c0_56] : memref<16x128xf32, #tpu.memory_space<vmem>>, vector<1x128xf32>
      tpu.vector_store %arg3[%88, %c0_56], %87 {strides = array<i32>} : memref<16x128xf32, #tpu.memory_space<vmem>>, vector<1x128xf32>,
      %c8_i32_57 = arith.constant 8 : i32
      %90 = arith.addi %67, %c8_i32_57 : i32
      %c16_i32_58 = arith.constant 16 : i32
      %91 = arith.cmpi slt, %90, %c16_i32_58 : i32
      %92 = arith.extui %91 : i1 to i32
      %c0_i32_59 = arith.constant 0 : i32
      %93 = arith.cmpi ne, %92, %c0_i32_59 : i32
      scf.if %93 {
        %c8_i32_60 = arith.constant 8 : i32
        %94 = arith.addi %67, %c8_i32_60 : i32
        %c8_i32_61 = arith.constant 8 : i32
        %c0_i32_62 = arith.constant 0 : i32
        %95 = arith.cmpi eq, %c8_i32_61, %c0_i32_62 : i32
        %c1_i32_63 = arith.constant 1 : i32
        %96 = arith.select %95, %c1_i32_63, %c8_i32_61 : i32
        %97 = arith.remsi %94, %96 : i32
        %c0_i32_64 = arith.constant 0 : i32
        %98 = arith.cmpi ne, %97, %c0_i32_64 : i32
        %c0_i32_65 = arith.constant 0 : i32
        %99 = arith.cmpi slt, %97, %c0_i32_65 : i32
        %c0_i32_66 = arith.constant 0 : i32
        %100 = arith.cmpi slt, %96, %c0_i32_66 : i32
        %101 = arith.xori %99, %100 : i1
        %102 = arith.andi %101, %98 : i1
        %103 = arith.addi %97, %96 : i32
        %104 = arith.select %102, %103, %97 : i32
        %105 = arith.addi %0, %94 : i32
        %106 = arith.index_cast %105 : i32 to index
        %107 = memref.load %arg1[%106] : memref<16xi32, #tpu.memory_space<smem>>
        %c0_i32_67 = arith.constant 0 : i32
        %108 = tpu.memref_slice %arg2[%107, %c0_i32_67] : memref<64x128xf32, #tpu.memory_space<any>> -> memref<1x128xf32, #tpu.memory_space<any>>
        %c0_i32_68 = arith.constant 0 : i32
        %c0_i32_69 = arith.constant 0 : i32
        %109 = tpu.memref_slice %arg4[%104, %c0_i32_68, %c0_i32_69] : memref<8x1x128xf32, #tpu.memory_space<vmem>> -> memref<1x1x128xf32, #tpu.memory_space<vmem>>
        %110 = tpu.memref_squeeze %109 : memref<1x1x128xf32, #tpu.memory_space<vmem>> -> memref<1x128xf32, #tpu.memory_space<vmem>>
        %111 = tpu.memref_slice %arg5[%104] : memref<8x!tpu.dma_semaphore, #tpu.memory_space<semaphore_mem>> -> memref<1x!tpu.dma_semaphore, #tpu.memory_space<semaphore_mem>>
        %112 = tpu.memref_squeeze %111 : memref<1x!tpu.dma_semaphore, #tpu.memory_space<semaphore_mem>> -> memref<!tpu.dma_semaphore, #tpu.memory_space<semaphore_mem>>
        tpu.enqueue_dma source(%108 : memref<1x128xf32, #tpu.memory_space<any>>) target(%110 : memref<1x128xf32, #tpu.memory_space<vmem>>) target_semaphore(%112 : memref<!tpu.dma_semaphore, #tpu.memory_space<semaphore_mem>>)
      } else {
      }
    }
    %c16_i32_43 = arith.constant 16 : i32
    return
  }
  func.func @transform_1(%arg0: i32, %arg1: memref<16xi32, #tpu.memory_space<smem>>) -> (i32, i32) {
    %c0_i32 = arith.constant 0 : i32
    %c0_i32_0 = arith.constant 0 : i32
    return %arg0, %c0_i32 : i32, i32
  }
}

</mosaic_0001>

<bundles_post_ra>
// kernel: tpu_custom_call.1
= control target key start
LH: loop header
LB: loop body
LE: loop exit
PB: predicated region body
PF: predicated region fallthrough
CT: control target
= control target key end

     0   :  { %s846_s0 = inlined_call_operand.hbm [shape: s32[16], index: 0, kind: input, shape index: {}]   ;;  %s847_s1 = inlined_call_operand.hbm [shape: f32[64,128], index: 1, kind: input, shape index: {}]   ;;  %s848_s2 = inlined_call_operand.hbm [shape: f32[16,128], index: 2, kind: output, shape index: {}]  }
   0x1   :  { %s362_s11 = scalar_lea.hbm %s846_s0, 16 }
   0x2   :  { %p363_p0 = scmp.ne.s32.totalorder %s846_s0, %s362_s11  ;;  %p366_p1 = scmp.lt.u32.totalorder %s362_s11, %s846_s0 }
   0x4   :  { %p368_p2 = pnand %p366_p1, %p363_p0 }
   0x6   :  { %371 = shalt.err (!%p368_p2)  }
   0x7   :  { %s628_s16 = smov [#allocation5]  }
   0x8   :  { %8 = dma.hbm_to_smem %s846_s0, 16, %s628_s16, [#allocation4] }
   0x9   :  { %618 = dma.done.wait [#allocation4], 16 }
   0xa   :  { %619 = vsyncadd [#allocation4], 4294967280 }
   0xb   :  { %10 = sfence }
   0xc   :  { %11 = vsyncpa [#allocation7], 0  ;;  %s13_s19 = sld [smem:[#allocation5]]  ;;  %s629_s20 = smov [#allocation2]  }
   0xd   :  { %s23_s21 = sshll.u32 %s629_s20, 4  ;;  %s667_s22 = sld [smem:[#allocation5 + $0x1]]  ;;  %s669_s21 = int_to_ptr.vmem [resolvable:$true] %s23_s21 }
   0xe   :  { %s630_s23 = smov [#allocation2 + $0x1]   ;;  %s671_s25 = sld [smem:[#allocation5 + $0x2]] }
   0xf   :  { %s40_s24 = sshll.u32 %s630_s23, 4  ;;  %s631_s26 = smov [#allocation2 + $0x2]   ;;  %s673_s24 = int_to_ptr.vmem [resolvable:$true] %s40_s24 }
  0x10   :  { %s57_s0 = sshll.u32 %s631_s26, 4  ;;  %s675_s27 = sld [smem:[#allocation5 + $0x3]]  ;;  %s677_s0 = int_to_ptr.vmem [resolvable:$true] %s57_s0 }
  0x11   :  { %s686_s8 = scalar_lea.hbm %s847_s1, 1024 }
  0x12   :  { %s306_s28 = sshll.u32 %s13_s19, 4 }
  0x13   :  { %s15_s3 = scalar_lea.hbm %s847_s1, %s306_s28  ;;  %s308_s4 = sshll.u32 %s667_s22, 4 }
  0x14   :  { %s372_s5 = scalar_lea.hbm %s15_s3, 16  ;;  %p375_p4 = scmp.lt.u32.totalorder %s15_s3, %s847_s1 }
  0x15   :  { %p373_p3 = scmp.ne.s32.totalorder %s15_s3, %s372_s5  ;;  %p376_p5 = scmp.lt.u32.totalorder %s686_s8, %s372_s5 }
  0x16   :  { %p378_p7 = scmp.lt.u32.totalorder %s372_s5, %s15_s3 }
  0x17   :  { %p377_p6 = por %p376_p5, %p375_p4 }
  0x19   :  { %p379_p8 = por %p378_p7, %p377_p6 }
  0x1b   :  { %p380_p9 = pnand %p379_p8, %p373_p3 }
  0x1d   :  { %383 = shalt.err (!%p380_p9)  }
  0x1e   :  { %s384_s11 = scalar_lea.vmem %s669_s21, 16  ;;  %s695_s12 = scalar_lea.vmem %s669_s21, 128 }
  0x1f   :  { %p385_p10 = scmp.ne.s32.totalorder %s669_s21, %s384_s11  ;;  %p389_p11 = scmp.lt.s32.totalorder %s669_s21, %s669_s21 }
  0x20   :  { %p390_p12 = scmp.lt.s32.totalorder %s695_s12, %s384_s11 }
  0x22   :  { %p391_p13 = por %p390_p12, %p389_p11 }
  0x24   :  { %p392_p0 = pnand %p391_p13, %p385_p10 }
  0x26   :  { %395 = shalt.err (!%p392_p0)  }
  0x27   :  { %26 = dma.hbm_to_vmem [thread:$0]  %s15_s3, 16, %s669_s21, [#allocation3] }
  0x28   :  { %s30_s15 = scalar_lea.hbm %s847_s1, %s308_s4  ;;  %s310_s16 = sshll.u32 %s671_s25, 4 }
  0x29   :  { %s396_s17 = scalar_lea.hbm %s30_s15, 16  ;;  %p399_p2 = scmp.lt.u32.totalorder %s30_s15, %s847_s1 }
  0x2a   :  { %p397_p1 = scmp.ne.s32.totalorder %s30_s15, %s396_s17  ;;  %p400_p3 = scmp.lt.u32.totalorder %s686_s8, %s396_s17 }
  0x2b   :  { %p402_p5 = scmp.lt.u32.totalorder %s396_s17, %s30_s15 }
  0x2c   :  { %p401_p4 = por %p400_p3, %p399_p2 }
  0x2e   :  { %p403_p6 = por %p402_p5, %p401_p4 }
  0x30   :  { %p404_p7 = pnand %p403_p6, %p397_p1 }
  0x32   :  { %407 = shalt.err (!%p404_p7)  }
  0x33   :  { %s408_s20 = scalar_lea.vmem %s673_s24, 16  ;;  %p413_p9 = scmp.lt.s32.totalorder %s673_s24, %s669_s21 }
  0x34   :  { %p409_p8 = scmp.ne.s32.totalorder %s673_s24, %s408_s20  ;;  %p414_p10 = scmp.lt.s32.totalorder %s695_s12, %s408_s20 }
  0x36   :  { %p415_p11 = por %p414_p10, %p413_p9 }
  0x38   :  { %p416_p12 = pnand %p415_p11, %p409_p8 }
  0x3a   :  { %419 = shalt.err (!%p416_p12)  }
  0x3b   :  { %43 = dma.hbm_to_vmem [thread:$0]  %s30_s15, 16, %s673_s24, [#allocation3 + $0x1] }
  0x3c   :  { %s47_s25 = scalar_lea.hbm %s847_s1, %s310_s16  ;;  %s312_s26 = sshll.u32 %s675_s27, 4 }
  0x3d   :  { %s420_s28 = scalar_lea.hbm %s47_s25, 16  ;;  %p423_p0 = scmp.lt.u32.totalorder %s47_s25, %s847_s1 }
  0x3e   :  { %p421_p13 = scmp.ne.s32.totalorder %s47_s25, %s420_s28  ;;  %p424_p1 = scmp.lt.u32.totalorder %s686_s8, %s420_s28 }
  0x3f   :  { %p426_p3 = scmp.lt.u32.totalorder %s420_s28, %s47_s25 }
  0x40   :  { %p425_p2 = por %p424_p1, %p423_p0 }
  0x42   :  { %p427_p4 = por %p426_p3, %p425_p2 }
  0x44   :  { %p428_p5 = pnand %p427_p4, %p421_p13 }
  0x46   :  { %431 = shalt.err (!%p428_p5)  }
  0x47   :  { %s432_s24 = scalar_lea.vmem %s677_s0, 16  ;;  %p437_p7 = scmp.lt.s32.totalorder %s677_s0, %s669_s21 }
  0x48   :  { %p433_p6 = scmp.ne.s32.totalorder %s677_s0, %s432_s24  ;;  %p438_p8 = scmp.lt.s32.totalorder %s695_s12, %s432_s24 }
  0x4a   :  { %p439_p9 = por %p438_p8, %p437_p7 }
  0x4c   :  { %p440_p10 = pnand %p439_p9, %p433_p6 }
  0x4e   :  { %443 = shalt.err (!%p440_p10)  }
  0x4f   :  { %60 = dma.hbm_to_vmem [thread:$0]  %s47_s25, 16, %s677_s0, [#allocation3 + $0x2] }
  0x50   :  { %s64_s4 = scalar_lea.hbm %s847_s1, %s312_s26  ;;  %s632_s5 = smov [#allocation2 + $0x3]  }
  0x51   :  { %s74_s6 = sshll.u32 %s632_s5, 4  ;;  %s732_s7 = sld [smem:[#allocation5 + $0x4]]  ;;  %s75_s6 = int_to_ptr.vmem [resolvable:$true] %s74_s6 }
  0x52   :  { %s444_s9 = scalar_lea.hbm %s64_s4, 16  ;;  %p447_p12 = scmp.lt.u32.totalorder %s64_s4, %s847_s1 }
  0x53   :  { %p445_p11 = scmp.ne.s32.totalorder %s64_s4, %s444_s9  ;;  %p448_p13 = scmp.lt.u32.totalorder %s686_s8, %s444_s9 }
  0x54   :  { %p450_p1 = scmp.lt.u32.totalorder %s444_s9, %s64_s4 }
  0x55   :  { %p449_p0 = por %p448_p13, %p447_p12 }
  0x57   :  { %p451_p2 = por %p450_p1, %p449_p0 }
  0x59   :  { %p452_p3 = pnand %p451_p2, %p445_p11 }
  0x5b   :  { %455 = shalt.err (!%p452_p3)  }
  0x5c   :  { %s456_s0 = scalar_lea.vmem %s75_s6, 16  ;;  %p461_p5 = scmp.lt.s32.totalorder %s75_s6, %s669_s21 }
  0x5d   :  { %p457_p4 = scmp.ne.s32.totalorder %s75_s6, %s456_s0  ;;  %p462_p6 = scmp.lt.s32.totalorder %s695_s12, %s456_s0 }
  0x5f   :  { %p463_p7 = por %p462_p6, %p461_p5 }
  0x61   :  { %p464_p8 = pnand %p463_p7, %p457_p4 }
  0x63   :  { %467 = shalt.err (!%p464_p8)  }
  0x64   :  { %77 = dma.hbm_to_vmem [thread:$0]  %s64_s4, 16, %s75_s6, [#allocation3 + $0x3] }
  0x65   :  { %s633_s13 = smov [#allocation2 + $0x4]   ;;  %s740_s15 = sld [smem:[#allocation5 + $0x5]] }
  0x66   :  { %s91_s14 = sshll.u32 %s633_s13, 4  ;;  %s634_s16 = smov [#allocation2 + $0x5]   ;;  %s92_s14 = int_to_ptr.vmem [resolvable:$true] %s91_s14 }
  0x67   :  { %s108_s17 = sshll.u32 %s634_s16, 4  ;;  %s742_s18 = sld [smem:[#allocation5 + $0x6]]  ;;  %s745_s17 = int_to_ptr.vmem [resolvable:$true] %s108_s17 }
  0x68   :  { %s314_s19 = sshll.u32 %s732_s7, 4 }
  0x69   :  { %s81_s23 = scalar_lea.hbm %s847_s1, %s314_s19 }
  0x6a   :  { %s468_s25 = scalar_lea.hbm %s81_s23, 16  ;;  %p471_p10 = scmp.lt.u32.totalorder %s81_s23, %s847_s1 }
  0x6b   :  { %p469_p9 = scmp.ne.s32.totalorder %s81_s23, %s468_s25  ;;  %p472_p11 = scmp.lt.u32.totalorder %s686_s8, %s468_s25 }
  0x6c   :  { %p474_p13 = scmp.lt.u32.totalorder %s468_s25, %s81_s23 }
  0x6d   :  { %p473_p12 = por %p472_p11, %p471_p10 }
  0x6f   :  { %p475_p0 = por %p474_p13, %p473_p12 }
  0x71   :  { %p476_p1 = pnand %p475_p0, %p469_p9 }
  0x73   :  { %479 = shalt.err (!%p476_p1)  }
  0x74   :  { %s480_s29 = scalar_lea.vmem %s92_s14, 16  ;;  %p485_p3 = scmp.lt.s32.totalorder %s92_s14, %s669_s21 }
  0x75   :  { %p481_p2 = scmp.ne.s32.totalorder %s92_s14, %s480_s29  ;;  %p486_p4 = scmp.lt.s32.totalorder %s695_s12, %s480_s29 }
  0x77   :  { %p487_p5 = por %p486_p4, %p485_p3 }
  0x79   :  { %p488_p6 = pnand %p487_p5, %p481_p2 }
  0x7b   :  { %491 = shalt.err (!%p488_p6)  }
  0x7c   :  { %94 = dma.hbm_to_vmem [thread:$0]  %s81_s23, 16, %s92_s14, [#allocation3 + $0x4] }
  0x7d   :  { %s316_s30 = sshll.u32 %s740_s15, 4  ;;  %s635_s24 = smov [#allocation2 + $0x6]  }
  0x7e   :  { %s125_s27 = sshll.u32 %s635_s24, 4  ;;  %s98_s5 = scalar_lea.hbm %s847_s1, %s316_s30  ;;  %s760_s27 = int_to_ptr.vmem [resolvable:$true] %s125_s27 }
  0x7f   :  { %s492_s6 = scalar_lea.hbm %s98_s5, 16  ;;  %p495_p8 = scmp.lt.u32.totalorder %s98_s5, %s847_s1 }
  0x80   :  { %p493_p7 = scmp.ne.s32.totalorder %s98_s5, %s492_s6  ;;  %p496_p9 = scmp.lt.u32.totalorder %s686_s8, %s492_s6 }
  0x81   :  { %p498_p11 = scmp.lt.u32.totalorder %s492_s6, %s98_s5 }
  0x82   :  { %p497_p10 = por %p496_p9, %p495_p8 }
  0x84   :  { %p499_p12 = por %p498_p11, %p497_p10 }
  0x86   :  { %p500_p13 = pnand %p499_p12, %p493_p7 }
  0x88   :  { %503 = shalt.err (!%p500_p13)  }
  0x89   :  { %s504_s10 = scalar_lea.vmem %s745_s17, 16  ;;  %p509_p1 = scmp.lt.s32.totalorder %s745_s17, %s669_s21 }
  0x8a   :  { %p505_p0 = scmp.ne.s32.totalorder %s745_s17, %s504_s10  ;;  %p510_p2 = scmp.lt.s32.totalorder %s695_s12, %s504_s10 }
  0x8c   :  { %p511_p3 = por %p510_p2, %p509_p1 }
  0x8e   :  { %p512_p4 = pnand %p511_p3, %p505_p0 }
  0x90   :  { %515 = shalt.err (!%p512_p4)  }
  0x91   :  { %111 = dma.hbm_to_vmem [thread:$0]  %s98_s5, 16, %s745_s17, [#allocation3 + $0x5] }
  0x92   :  { %s318_s11 = sshll.u32 %s742_s18, 4  ;;  %s319_s0 = sld [smem:[#allocation5 + $0x7]] }
  0x93   :  { %s115_s15 = scalar_lea.hbm %s847_s1, %s318_s11 }
  0x94   :  { %s516_s16 = scalar_lea.hbm %s115_s15, 16  ;;  %p519_p6 = scmp.lt.u32.totalorder %s115_s15, %s847_s1 }
  0x95   :  { %p517_p5 = scmp.ne.s32.totalorder %s115_s15, %s516_s16  ;;  %p520_p7 = scmp.lt.u32.totalorder %s686_s8, %s516_s16 }
  0x96   :  { %p522_p9 = scmp.lt.u32.totalorder %s516_s16, %s115_s15 }
  0x97   :  { %p521_p8 = por %p520_p7, %p519_p6 }
  0x99   :  { %p523_p10 = por %p522_p9, %p521_p8 }
  0x9b   :  { %p524_p11 = pnand %p523_p10, %p517_p5 }
  0x9d   :  { %527 = shalt.err (!%p524_p11)  }
  0x9e   :  { %s528_s17 = scalar_lea.vmem %s760_s27, 16  ;;  %p533_p13 = scmp.lt.s32.totalorder %s760_s27, %s669_s21 }
  0x9f   :  { %p529_p12 = scmp.ne.s32.totalorder %s760_s27, %s528_s17  ;;  %p534_p0 = scmp.lt.s32.totalorder %s695_s12, %s528_s17 }
  0xa1   :  { %p535_p1 = por %p534_p0, %p533_p13 }
  0xa3   :  { %p536_p2 = pnand %p535_p1, %p529_p12 }
  0xa5   :  { %539 = shalt.err (!%p536_p2)  }
  0xa6   :  { %128 = dma.hbm_to_vmem [thread:$0]  %s115_s15, 16, %s760_s27, [#allocation3 + $0x6] }
  0xa7   :  { %s636_s18 = smov [#allocation2 + $0x7]   ;;  %s320_s23 = sshll.u32 %s319_s0, 4 }
  0xa8   :  { %s142_s22 = sshll.u32 %s636_s18, 4  ;;  %s132_s28 = scalar_lea.hbm %s847_s1, %s320_s23  ;;  %s143_s22 = int_to_ptr.vmem [resolvable:$true] %s142_s22 }
  0xa9   :  { %s540_s29 = scalar_lea.hbm %s132_s28, 16  ;;  %p543_p4 = scmp.lt.u32.totalorder %s132_s28, %s847_s1 }
  0xaa   :  { %p541_p3 = scmp.ne.s32.totalorder %s132_s28, %s540_s29  ;;  %p544_p5 = scmp.lt.u32.totalorder %s686_s8, %s540_s29 }
  0xab   :  { %p546_p7 = scmp.lt.u32.totalorder %s540_s29, %s132_s28 }
  0xac   :  { %p545_p6 = por %p544_p5, %p543_p4 }
  0xae   :  { %p547_p8 = por %p546_p7, %p545_p6 }
  0xb0   :  { %p548_p9 = pnand %p547_p8, %p541_p3 }
  0xb2   :  { %551 = shalt.err (!%p548_p9)  }
  0xb3   :  { %s552_s27 = scalar_lea.vmem %s143_s22, 16  ;;  %p557_p11 = scmp.lt.s32.totalorder %s143_s22, %s669_s21 }
  0xb4   :  { %p553_p10 = scmp.ne.s32.totalorder %s143_s22, %s552_s27  ;;  %p558_p12 = scmp.lt.s32.totalorder %s695_s12, %s552_s27 }
  0xb6   :  { %p559_p13 = por %p558_p12, %p557_p11 }
  0xb8   :  { %p560_p0 = pnand %p559_p13, %p553_p10 }
  0xba   :  { %563 = shalt.err (!%p560_p0)  }
  0xbb   :  { %145 = dma.hbm_to_vmem [thread:$0]  %s132_s28, 16, %s143_s22, [#allocation3 + $0x7] }
  0xbc   :  { %s795_s3 = smov 0  }
  0xbd LB: > { %p152_p1 = scmp.lt.s32.totalorder %s626_s3, 0  ;;  %s153_s4 = ssub.s32 0, %s626_s3  ;;  %s626_s3 = sphi %s795_s3, %s151_s3  }
  0xbe   : > { %s321_s5 = smin.u32 %s626_s3, %s153_s4 }
  0xbf   : > { %s155_s6 = sand.u32 7, %s321_s5  }
  0xc0   : > { %s156_s7 = ssub.s32 0, %s155_s6 }
  0xc1   : > { %s850_s7 = smov (!%p152_p1, %s156_s7), %s155_s6 }
  0xc2   : > { %p323_p2 = scmp.lt.s32.totalorder %s850_s7, 0  ;;  %s162_s9 = sadd.s32 8, %s850_s7 }
  0xc4   : > { %s852_s9 = smov (!%p323_p2, %s162_s9), %s850_s7 }
  0xc5   : > { %s164_s10 = scalar_lea.vmem [#allocation2], %s852_s9  ;;  %s165_s11 = scalar_lea.sflag [#allocation3], %s852_s9 }
  0xc6   : > { %620 = dma.done.wait %s165_s11, 16 }
  0xc7   : > { %621 = vsyncadd %s165_s11, 4294967280  ;;  %s804_s0 = sadd.s32 8, %s626_s3  ;;  %v169_v0 = vld [vmem:[%s164_s10] sm:$0x1]  ;;  %s171_s18 = scalar_lea.vmem [#allocation6], %s626_s3 }
  0xc8   : > { %p341_p3 = scmp.lt.s32.totalorder %s804_s0, 16  ;;  %p178_p4 = scmp.lt.s32.totalorder %s804_s0, 0  ;;  %v170_v1 = vmul.f32 11.313708, %v169_v0 }
  0xc9   : > { %s179_s13 = ssub.s32 0, %s804_s0 }
  0xca   : > { %s338_s14 = scalar_select %p341_p3, [#allocation5], [#allocation28]  ;;  %172 = vst [vmem:[%s171_s18] sm:$0x1] %v170_v1 }
  0xcb   : > { %s339_s15 = scalar_select %p341_p3, %s804_s0, 0 }
  0xcc   : > { %s325_s16 = smin.u32 %s179_s13, %s804_s0 }
  0xcd   : > { %s191_s19 = sld [smem:[%s338_s14 + %s339_s15]]  ;;  %s181_s20 = sand.u32 7, %s325_s16  }
  0xce   : > { %s182_s17 = ssub.s32 0, %s181_s20 }
  0xcf   : > { %s854_s17 = smov (!%p178_p4, %s182_s17), %s181_s20 }
  0xd0   : > { %p327_p5 = scmp.lt.s32.totalorder %s854_s17, 0  ;;  %s188_s22 = sadd.s32 8, %s854_s17 }
  0xd2   : > { %s856_s22 = smov (!%p327_p5, %s188_s22), %s854_s17 }
  0xd3   : > { %s328_s23 = sshll.u32 %s191_s19, 4  ;;  %s194_s29 = scalar_lea.vmem [#allocation2], %s856_s22 }
  0xd4   : > { %s193_s28 = scalar_lea.hbm %s847_s1, %s328_s23  ;;  %s203_s30 = sshll.u32 %s194_s29, 4  ;;  %s204_s30 = int_to_ptr.vmem [resolvable:$true] %s203_s30 }
  0xd5   : > { %s195_s24 = scalar_lea.sflag [#allocation3], %s856_s22  ;;  %s564_s27 = scalar_lea.hbm %s193_s28, 16 }
  0xd6   : > { %p565_p6 = scmp.ne.s32.totalorder %s193_s28, %s564_s27  ;;  %p569_p9 = scmp.lt.u32.totalorder %s193_s28, %s847_s1 }
  0xd7   : > { %p570_p10 = scmp.lt.u32.totalorder %s686_s8, %s564_s27  ;;  %p572_p12 = scmp.lt.u32.totalorder %s564_s27, %s193_s28 }
  0xd8   : > { %p566_p7 = pnand %p565_p6, %p341_p3 }
  0xd9   : > { %p571_p11 = por %p570_p10, %p569_p9 }
  0xda   : > { %p567_p8 = pneg %p566_p7 }
  0xdb   : > { %p573_p13 = por %p572_p12, %p571_p11 }
  0xdd   : > { %p574_p0 = pnand %p573_p13, %p567_p8 }
  0xdf   : > { %577 = shalt.err (!%p574_p0)  }
  0xe0   : > { %s578_s6 = scalar_lea.vmem %s204_s30, 16  ;;  %p585_p5 = scmp.lt.s32.totalorder %s204_s30, %s669_s21 }
  0xe1   : > { %p579_p1 = scmp.ne.s32.totalorder %s204_s30, %s578_s6  ;;  %p586_p6 = scmp.lt.s32.totalorder %s695_s12, %s578_s6 }
  0xe3   : > { %p580_p2 = pnand %p579_p1, %p341_p3  ;;  %p587_p7 = por %p586_p6, %p585_p5 }
  0xe5   : > { %p581_p4 = pneg %p580_p2 }
  0xe7   : > { %p588_p9 = pnand %p587_p7, %p581_p4 }
  0xe9   : > { %591 = shalt.err (!%p588_p9)  }
  0xea   : > { %340 = dma.hbm_to_vmem [thread:$0]  (%p341_p3), %s193_s28, 16, %s204_s30, %s195_s24 }
  0xeb   : > { %s151_s3 = sadd.s32 1, %s626_s3  }
  0xec   : > { %p148_p8 = scmp.ge.s32.totalorder %s151_s3, 16  }
  0xed   :  { %s637_s7 = smov (%p148_p8), [#allocation6]  }
  0xee   :  { %150 = sbr.rel (!%p148_p8) target bundleno = 189 (0xbd), region = 102  ;;  %s212_s9 = sshll.u32 (%p148_p8), %s637_s7, 4  ;;  %s213_s9 = int_to_ptr.vmem [resolvable:$true] %s212_s9 }
  0xef   :  { %s592_s10 = scalar_lea.vmem (%p148_p8), %s213_s9, 256  ;;  %p597_p11 = scmp.lt.s32.totalorder (%p148_p8), %s213_s9, %s213_s9 }
  0xf0   :  { %p593_p10 = scmp.ne.s32.totalorder (%p148_p8), %s213_s9, %s592_s10  ;;  %p598_p12 = scmp.lt.s32.totalorder (%p148_p8), %s592_s10, %s592_s10 }
  0xf2   :  { %p599_p13 = por (%p148_p8), %p598_p12, %p597_p11 }
  0xf4   :  { %p600_p0 = pnand (%p148_p8), %p599_p13, %p593_p10 }
  0xf6   :  { %603 = shalt.err (!%p600_p0)
}
  0xf7   :  { %s604_s0 = scalar_lea.hbm %s848_s2, 256 }
  0xf8   :  { %p605_p3 = scmp.ne.s32.totalorder %s848_s2, %s604_s0  ;;  %p608_p1 = scmp.lt.u32.totalorder %s604_s0, %s848_s2 }
  0xfa   :  { %p610_p2 = pnand %p608_p1, %p605_p3 }
  0xfc   :  { %613 = shalt.err (!%p610_p2)
}
  0xfd   :  { %s638_s1 = smov 128   ;;  %s639_s21 = smov 8  }
  0xfe   :  { %218 = dma.vmem_to_hbm [thread:$0]  %s213_s9, 256, %s848_s2, [#allocation7], %s638_s1, %s638_s1, %s639_s21  }
  0xff   :  { %622 = dma.done.wait [#allocation7], 256  }
 0x100   :  { %623 = vsyncadd [#allocation7], 4294967040 }
 0x101   :  { %222 = vsyncpa [#allocation7], 1 }
 0x102   :  { %223 = vsyncmov [#allocation3] }
 0x105   :  { %s224_s19 = vpop.sfrf %223 }
 0x106   :  { %p329_p4 = scmp.ne.s32.totalorder %s224_s19, 0 }
 0x108   :  { %228 = shalt.err (%p329_p4)  }
 0x109   :  { %230 = vsyncmov [#allocation3 + $0x1] }
 0x10c   :  { %s231_s20 = vpop.sfrf %230 }
 0x10d   :  { %p330_p5 = scmp.ne.s32.totalorder %s231_s20, 0 }
 0x10f   :  { %235 = shalt.err (%p330_p5)  }
 0x110   :  { %237 = vsyncmov [#allocation3 + $0x2] }
 0x113   :  { %s238_s17 = vpop.sfrf %237 }
 0x114   :  { %p331_p6 = scmp.ne.s32.totalorder %s238_s17, 0 }
 0x116   :  { %242 = shalt.err (%p331_p6)  }
 0x117   :  { %244 = vsyncmov [#allocation3 + $0x3] }
 0x11a   :  { %s245_s18 = vpop.sfrf %244 }
 0x11b   :  { %p332_p7 = scmp.ne.s32.totalorder %s245_s18, 0 }
 0x11d   :  { %249 = shalt.err (%p332_p7)  }
 0x11e   :  { %251 = vsyncmov [#allocation3 + $0x4] }
 0x121   :  { %s252_s2 = vpop.sfrf %251 }
 0x122   :  { %p333_p9 = scmp.ne.s32.totalorder %s252_s2, 0 }
 0x124   :  { %256 = shalt.err (%p333_p9)  }
 0x125   :  { %258 = vsyncmov [#allocation3 + $0x5] }
 0x128   :  { %s259_s22 = vpop.sfrf %258 }
 0x129   :  { %p334_p8 = scmp.ne.s32.totalorder %s259_s22, 0 }
 0x12b   :  { %263 = shalt.err (%p334_p8)  }
 0x12c   :  { %265 = vsyncmov [#allocation3 + $0x6] }
 0x12f   :  { %s266_s23 = vpop.sfrf %265 }
 0x130   :  { %p335_p10 = scmp.ne.s32.totalorder %s266_s23, 0 }
 0x132   :  { %270 = shalt.err (%p335_p10)  }
 0x133   :  { %272 = vsyncmov [#allocation3 + $0x7] }
 0x136   :  { %s273_s25 = vpop.sfrf %272 }
 0x137   :  { %p336_p11 = scmp.ne.s32.totalorder %s273_s25, 0 }
 0x139   :  { %277 = shalt.err (%p336_p11)  }

</bundles_post_ra>
